<compile_context>
chip_gen: v6e
topology: v6e:2x2x1
jax: 0.10.0
libtpu: 0.0.40
codegen_flags: <defaults>
</compile_context>

<pallas_src>
import functools

import jax
import jax.numpy as jnp
from jax import lax
from jax.experimental import pallas as pl
from jax.experimental.pallas import tpu as pltpu

_NEG_BIG = -1e30  # large finite negative, avoids -inf/-NaN paths in the softmax


# ---------------------------------------------------------------------------
# Tiled matmul + bias kernel (fused QKV projection and output projection).
# ---------------------------------------------------------------------------

def _matmul_bias_kernel(x_ref, w_ref, b_ref, o_ref, acc_ref):
    k = pl.program_id(2)

    @pl.when(k == 0)
    def _init():
        acc_ref[...] = jnp.zeros(acc_ref.shape, acc_ref.dtype)

    # bf16 MXU matmul, f32 accumulation; w is pre-transposed (K, N) and
    # pre-cast to bf16 by the wrapper, so no in-kernel transpose is needed.
    acc_ref[...] += jnp.dot(
        x_ref[...].astype(jnp.bfloat16),
        w_ref[...],
        preferred_element_type=jnp.float32,
    )

    @pl.when(k == pl.num_programs(2) - 1)
    def _finalize():
        o_ref[...] = (acc_ref[...] + b_ref[...]).astype(o_ref.dtype)


def _pick_tile(dim, pref):
    return pref if dim % pref == 0 else dim


def matmul_bias(x, w_t, b, out_dtype):
    """y = x @ w_t + b.   x: (M, K), w_t: (K, N) bf16, b: (N,) f32."""
    M, K = x.shape
    N = w_t.shape[1]
    tm = _pick_tile(M, 128)
    tn = _pick_tile(N, 128)
    tk = _pick_tile(K, 256)
    return pl.pallas_call(
        _matmul_bias_kernel,
        out_shape=jax.ShapeDtypeStruct((M, N), out_dtype),
        grid=(M // tm, N // tn, K // tk),
        in_specs=[
            pl.BlockSpec((tm, tk), lambda i, j, k: (i, k)),
            pl.BlockSpec((tk, tn), lambda i, j, k: (k, j)),
            pl.BlockSpec((1, tn), lambda i, j, k: (0, j)),
        ],
        out_specs=pl.BlockSpec((tm, tn), lambda i, j, k: (i, j)),
        scratch_shapes=[pltpu.VMEM((tm, tn), jnp.float32)],
        compiler_params=pltpu.CompilerParams(
            dimension_semantics=("parallel", "parallel", "arbitrary"),
        ),
    )(x, w_t, b.reshape(1, N).astype(jnp.float32))


# ---------------------------------------------------------------------------
# Flash-style sliding-window attention kernel (heads folded in the lane dim).
# ---------------------------------------------------------------------------

def _swa_flash_kernel(q_ref, k_ref, v_ref, cq_ref, sq_ref, ck_ref, sk_ref,
                      o_ref, m_sc, l_sc, acc_sc,
                      *, num_heads, head_dim, tq, tk, window, seq_len):
    qi = pl.program_id(1)
    j = pl.program_id(2)
    half = head_dim // 2

    @pl.when(j == 0)
    def _init():
        m_sc[...] = jnp.full(m_sc.shape, _NEG_BIG, jnp.float32)
        l_sc[...] = jnp.zeros(l_sc.shape, jnp.float32)
        acc_sc[...] = jnp.zeros(acc_sc.shape, jnp.float32)

    # Which kv tile does this grid step correspond to inside the window band?
    q_start = qi * tq
    first_blk = jnp.maximum(q_start - window, 0) // tk
    kv_start = (first_blk + j) * tk
    in_band = (kv_start < seq_len) & (kv_start <= q_start + tq - 1)

    @pl.when(in_band)
    def _compute():
        # Sliding-window causal mask bias for this (q-tile, kv-tile); it is the
        # same for every head, so compute it once outside the head loop.
        q_pos = q_start + lax.broadcasted_iota(jnp.int32, (tq, tk), 0)
        k_pos = kv_start + lax.broadcasted_iota(jnp.int32, (tq, tk), 1)
        keep = (k_pos <= q_pos) & (k_pos >= q_pos - window)
        bias = jnp.where(keep, 0.0, _NEG_BIG)

        cq, sq = cq_ref[...], sq_ref[...]
        ck, sk = ck_ref[...], sk_ref[...]

        def rope(xh, cos, sin):
            # rotate-half RoPE: out = x*[cos,cos] + [x2,x1]*[-sin,sin]
            # (the sign pattern is pre-baked into the sin table)
            rot = jnp.concatenate([xh[:, half:], xh[:, :half]], axis=-1)
            return xh * cos + rot * sin

        for h in range(num_heads):
            lo = h * head_dim
            hi = lo + head_dim
            qh = rope(q_ref[0, :, lo:hi].astype(jnp.float32), cq, sq)
            kh = rope(k_ref[0, :, lo:hi].astype(jnp.float32), ck, sk)
            vh = v_ref[0, :, lo:hi]

            # scores = Q K^T (bf16 MXU, f32 accumulate), no explicit transpose
            s = lax.dot_general(
                qh.astype(jnp.bfloat16), kh.astype(jnp.bfloat16),
                (((1,), (1,)), ((), ())),
                preferred_element_type=jnp.float32,
            ) + bias

            # online softmax update
            m_prev = m_sc[h]
            m_new = jnp.maximum(m_prev, jnp.max(s, axis=-1, keepdims=True))
            alpha = jnp.exp(m_prev - m_new)
            p = jnp.exp(s - m_new)
            l_sc[h] = alpha * l_sc[h] + jnp.sum(p, axis=-1, keepdims=True)
            acc_sc[h] = alpha * acc_sc[h] + jnp.dot(
                p.astype(jnp.bfloat16), vh, preferred_element_type=jnp.float32)
            m_sc[h] = m_new

    @pl.when(j == pl.num_programs(2) - 1)
    def _finalize():
        for h in range(num_heads):
            lo = h * head_dim
            inv_l = pl.reciprocal(l_sc[h], approx=True)
            o_ref[0, :, lo:lo + head_dim] = (acc_sc[h] * inv_l).astype(o_ref.dtype)


# ---------------------------------------------------------------------------
# Wrapper.
# ---------------------------------------------------------------------------

def _rope_tables(seq_len, head_dim):
    half = head_dim // 2
    inv_freq = 1.0 / (10000.0 ** (jnp.arange(half, dtype=jnp.float32) / half))
    ang = jnp.arange(seq_len, dtype=jnp.float32)[:, None] * inv_freq[None, :]
    cos = jnp.cos(ang)
    sin = jnp.sin(ang)
    cos2 = jnp.concatenate([cos, cos], axis=-1)       # (S, Dh)
    sin2 = jnp.concatenate([-sin, sin], axis=-1)      # signed for rotate-half
    return cos2, sin2


def local_sliding_window_attention(params, x, *, num_heads, window_size):
    B, S, D = x.shape
    H = num_heads
    Dh = D // H
    assert D % H == 0 and Dh % 2 == 0

    # ---- fused QKV projection (d**-0.5 folded into Wq / bq) -----------------
    scale = Dh ** -0.5
    w_qkv_t = jnp.concatenate(
        [params["wq"] * scale, params["wk"], params["wv"]], axis=0
    ).T.astype(jnp.bfloat16)                                      # (D, 3D)
    b_qkv = jnp.concatenate([params["bq"] * scale, params["bk"], params["bv"]])

    qkv = matmul_bias(x.reshape(B * S, D), w_qkv_t, b_qkv, jnp.bfloat16)
    qkv = qkv.reshape(B, S, 3 * D)

    cos, sin = _rope_tables(S, Dh)

    # ---- attention tiling ----------------------------------------------------
    tq = _pick_tile(S, 128)
    tk = tq
    n_q = S // tq
    n_k = S // tk
    # static upper bound on the number of kv tiles in the sliding-window band
    nb = max(
        min((qi * tq + tq - 1) // tk, n_k - 1)
        - max(qi * tq - window_size, 0) // tk + 1
        for qi in range(n_q)
    )

    if D % 128 == 0:
        # Read Q/K/V straight out of the fused (B, S, 3D) tensor via lane-block
        # offsets 0 / 1 / 2 -- no split / extra HBM pass.
        q_in = k_in = v_in = qkv
        kcol, vcol = 1, 2
    else:
        # TODO(synk): lane-unaligned D -- fall back to splitting QKV (one extra HBM pass).
        q_in = qkv[..., :D]
        k_in = qkv[..., D:2 * D]
        v_in = qkv[..., 2 * D:]
        kcol = vcol = 0

    def q_map(b, qi, j):
        return (b, qi, 0)

    def kv_map(col):
        def idx(b, qi, j):
            first = jnp.maximum(qi * tq - window_size, 0) // tk
            return (b, jnp.minimum(first + j, n_k - 1), col)
        return idx

    def qtab_map(b, qi, j):
        return (qi, 0)

    def ktab_map(b, qi, j):
        first = jnp.maximum(qi * tq - window_size, 0) // tk
        return (jnp.minimum(first + j, n_k - 1), 0)

    kernel = functools.partial(
        _swa_flash_kernel,
        num_heads=H, head_dim=Dh, tq=tq, tk=tk, window=window_size, seq_len=S)

    band = min(S, window_size + tq)
    cost = pl.CostEstimate(
        flops=int(4 * B * H * S * band * Dh),
        transcendentals=int(B * H * S * band),
        bytes_accessed=int(qkv.size * 2 * 2 + B * S * D * 2),
    )

    ctx = pl.pallas_call(
        kernel,
        out_shape=jax.ShapeDtypeStruct((B, S, D), jnp.bfloat16),
        grid=(B, n_q, nb),
        in_specs=[
            pl.BlockSpec((1, tq, D), q_map),
            pl.BlockSpec((1, tk, D), kv_map(kcol)),
            pl.BlockSpec((1, tk, D), kv_map(vcol)),
            pl.BlockSpec((tq, Dh), qtab_map),
            pl.BlockSpec((tq, Dh), qtab_map),
            pl.BlockSpec((tk, Dh), ktab_map),
            pl.BlockSpec((tk, Dh), ktab_map),
        ],
        out_specs=pl.BlockSpec((1, tq, D), lambda b, qi, j: (b, qi, 0)),
        scratch_shapes=[
            pltpu.VMEM((H, tq, 1), jnp.float32),    # running max
            pltpu.VMEM((H, tq, 1), jnp.float32),    # running denominator
            pltpu.VMEM((H, tq, Dh), jnp.float32),   # output accumulator
        ],
        compiler_params=pltpu.CompilerParams(
            dimension_semantics=("parallel", "parallel", "arbitrary"),
            vmem_limit_bytes=48 * 1024 * 1024,
        ),
        cost_estimate=cost,
    )(q_in, k_in, v_in, cos, sin, cos, sin)

    # ---- output projection (ctx already in (B, S, D) layout, no transpose) ---
    w_o_t = params["wo"].T.astype(jnp.bfloat16)
    out = matmul_bias(ctx.reshape(B * S, D), w_o_t, params["bo"], jnp.float32)
    return out.reshape(B, S, D)


# ---------------------------------------------------------------------------
# Parameter init (matches nn.Linear default init) and pure-JAX f32 reference.
# ---------------------------------------------------------------------------

def init_params(key, embed_dim):
    bound = 1.0 / float(embed_dim) ** 0.5
    ks = jax.random.split(key, 8)

    def u(k, shape):
        return jax.random.uniform(k, shape, jnp.float32, -bound, bound)

    return {
        "wq": u(ks[0], (embed_dim, embed_dim)), "bq": u(ks[1], (embed_dim,)),
        "wk": u(ks[2], (embed_dim, embed_dim)), "bk": u(ks[3], (embed_dim,)),
        "wv": u(ks[4], (embed_dim, embed_dim)), "bv": u(ks[5], (embed_dim,)),
        "wo": u(ks[6], (embed_dim, embed_dim)), "bo": u(ks[7], (embed_dim,)),
    }


def apply_rope_ref(x):
    # x: (B, H, S, Dh); rotate-half RoPE, base 10000
    _, _, S, Dh = x.shape
    half = Dh // 2
    inv_freq = 1.0 / (10000.0 ** (jnp.arange(half, dtype=jnp.float32) / half))
    ang = jnp.arange(S, dtype=jnp.float32)[:, None] * inv_freq[None, :]
    cos = jnp.cos(ang)[None, None]
    sin = jnp.sin(ang)[None, None]
    x1, x2 = x[..., :half], x[..., half:]
    return jnp.concatenate([x1 * cos - x2 * sin, x2 * cos + x1 * sin], axis=-1)


def reference(params, x, *, num_heads, window_size):
    B, S, D = x.shape
    H = num_heads
    Dh = D // H
    q = (x @ params["wq"].T + params["bq"]).reshape(B, S, H, Dh).transpose(0, 2, 1, 3)
    k = (x @ params["wk"].T + params["bk"]).reshape(B, S, H, Dh).transpose(0, 2, 1, 3)
    v = (x @ params["wv"].T + params["bv"]).reshape(B, S, H, Dh).transpose(0, 2, 1, 3)
    q = apply_rope_ref(q) * (Dh ** -0.5)
    k = apply_rope_ref(k)
    s = jnp.einsum("bhqd,bhkd->bhqk", q, k)
    qpos = jnp.arange(S)[:, None]
    kpos = jnp.arange(S)[None, :]
    keep = (kpos <= qpos) & (kpos >= qpos - window_size)
    s = jnp.where(keep[None, None], s, -jnp.inf)
    p = jax.nn.softmax(s, axis=-1)
    o = jnp.einsum("bhqk,bhkd->bhqd", p, v).transpose(0, 2, 1, 3).reshape(B, S, D)
    return o @ params["wo"].T + params["bo"]


# ---------------------------------------------------------------------------
# main
# ---------------------------------------------------------------------------

if __name__ == "__main__":
    # Small but tiling-exercising shapes: 2 q-tiles, banded (and skipped) kv
    # tiles, 2 heads folded in the lane dimension (head_dim = 256 -> all
    # in-kernel slices are 128-lane aligned).
    B, S = 2, 256
    embed_dim, num_heads, window_size = 512, 2, 64

    root = jax.random.PRNGKey(0)
    kp, kx = jax.random.split(root)
    params = init_params(kp, embed_dim)
    x = jax.random.normal(kx, (B, S, embed_dim), jnp.float32)

    out = local_sliding_window_attention(
        params, x, num_heads=num_heads, window_size=window_size)
    out = jax.block_until_ready(out)

    ref = reference(params, x, num_heads=num_heads, window_size=window_size)
    assert out.shape == (B, S, embed_dim)
    max_err = float(jnp.max(jnp.abs(out - ref)))
    assert jnp.allclose(out, ref, atol=3e-2, rtol=3e-2), (
        f"mismatch vs reference, max abs err = {max_err}")

    print("KERNEL_OK")
</pallas_src>

<mosaic_0001>
module attributes {stable_mosaic.version = 11 : i64} {
  func.func @_matmul_bias_kernel(%arg0: i32, %arg1: i32, %arg2: i32, %arg3: memref<128x256xf32, #tpu.memory_space<vmem>>, %arg4: memref<256x128xbf16, #tpu.memory_space<vmem>>, %arg5: memref<1x128xf32, #tpu.memory_space<vmem>>, %arg6: memref<128x128xbf16, #tpu.memory_space<vmem>>, %arg7: memref<128x128xf32, #tpu.memory_space<vmem>>) attributes {dimension_semantics = [#tpu.dimension_semantics<parallel>, #tpu.dimension_semantics<parallel>, #tpu.dimension_semantics<arbitrary>], iteration_bounds = array<i64: 4, 12, 2>, scalar_prefetch = 0 : i64, scratch_operands = 1 : i64, tpu.core_type = #tpu.core_type<tc>, window_params = [{transform_indices = @transform_0, window_bounds = array<i64: 128, 256>}, {transform_indices = @transform_1, window_bounds = array<i64: 256, 128>}, {transform_indices = @transform_2, window_bounds = array<i64: 1, 128>}, {transform_indices = @transform_3, window_bounds = array<i64: 128, 128>}]} {
    %c0_i32 = arith.constant 0 : i32
    %0 = arith.cmpi eq, %arg2, %c0_i32 : i32
    %1 = arith.extui %0 : i1 to i32
    %c0_i32_0 = arith.constant 0 : i32
    %2 = arith.cmpi ne, %1, %c0_i32_0 : i32
    scf.if %2 {
      %cst_9 = arith.constant 0.000000e+00 : f32
      %13 = vector.broadcast %cst_9 : f32 to vector<128x128xf32>
      %c0_10 = arith.constant 0 : index
      %c0_11 = arith.constant 0 : index
      %14 = vector.load %arg7[%c0_10, %c0_11] : memref<128x128xf32, #tpu.memory_space<vmem>>, vector<128x128xf32>
      tpu.vector_store %arg7[%c0_10, %c0_11], %13 {strides = array<i32>} : memref<128x128xf32, #tpu.memory_space<vmem>>, vector<128x128xf32>,
    } else {
    }
    %c0 = arith.constant 0 : index
    %c0_1 = arith.constant 0 : index
    %3 = vector.load %arg7[%c0, %c0_1] : memref<128x128xf32, #tpu.memory_space<vmem>>, vector<128x128xf32>
    %c0_2 = arith.constant 0 : index
    %c0_3 = arith.constant 0 : index
    %4 = vector.load %arg3[%c0_2, %c0_3] : memref<128x256xf32, #tpu.memory_space<vmem>>, vector<128x256xf32>
    %5 = arith.truncf %4 : vector<128x256xf32> to vector<128x256xbf16>
    %c0_4 = arith.constant 0 : index
    %c0_5 = arith.constant 0 : index
    %6 = vector.load %arg4[%c0_4, %c0_5] : memref<256x128xbf16, #tpu.memory_space<vmem>>, vector<256x128xbf16>
    %cst = arith.constant dense<0.000000e+00> : vector<128x128xf32>
    %7 = tpu.matmul %5, %6, %cst {dimension_numbers = #tpu.dot_dimension_numbers<[1], [0], [0], [1], [0, 0, 1, 1], [], []>} : vector<128x256xbf16>, vector<256x128xbf16>, vector<128x128xf32> -> vector<128x128xf32>
    %8 = arith.addf %3, %7 : vector<128x128xf32>
    %c0_6 = arith.constant 0 : index
    %c0_7 = arith.constant 0 : index
    %9 = vector.load %arg7[%c0_6, %c0_7] : memref<128x128xf32, #tpu.memory_space<vmem>>, vector<128x128xf32>
    tpu.vector_store %arg7[%c0_6, %c0_7], %8 {strides = array<i32>} : memref<128x128xf32, #tpu.memory_space<vmem>>, vector<128x128xf32>,
    %c1_i32 = arith.constant 1 : i32
    %10 = arith.cmpi eq, %arg2, %c1_i32 : i32
    %11 = arith.extui %10 : i1 to i32
    %c0_i32_8 = arith.constant 0 : i32
    %12 = arith.cmpi ne, %11, %c0_i32_8 : i32
    scf.if %12 {
      %c0_9 = arith.constant 0 : index
      %c0_10 = arith.constant 0 : index
      %13 = vector.load %arg7[%c0_9, %c0_10] : memref<128x128xf32, #tpu.memory_space<vmem>>, vector<128x128xf32>
      %c0_11 = arith.constant 0 : index
      %c0_12 = arith.constant 0 : index
      %14 = vector.load %arg5[%c0_11, %c0_12] : memref<1x128xf32, #tpu.memory_space<vmem>>, vector<1x128xf32>
      %15 = vector.broadcast %14 : vector<1x128xf32> to vector<128x128xf32>
      %16 = arith.addf %13, %15 : vector<128x128xf32>
      %17 = arith.truncf %16 : vector<128x128xf32> to vector<128x128xbf16>
      %c0_13 = arith.constant 0 : index
      %c0_14 = arith.constant 0 : index
      %18 = vector.load %arg6[%c0_13, %c0_14] : memref<128x128xbf16, #tpu.memory_space<vmem>>, vector<128x128xbf16>
      tpu.vector_store %arg6[%c0_13, %c0_14], %17 {strides = array<i32>} : memref<128x128xbf16, #tpu.memory_space<vmem>>, vector<128x128xbf16>,
    } else {
    }
    return
  }
  func.func @transform_0(%arg0: i32, %arg1: i32, %arg2: i32) -> (i32, i32) {
    %c0_i32 = arith.constant 0 : i32
    return %arg0, %arg2 : i32, i32
  }
  func.func @transform_1(%arg0: i32, %arg1: i32, %arg2: i32) -> (i32, i32) {
    %c0_i32 = arith.constant 0 : i32
    return %arg2, %arg1 : i32, i32
  }
  func.func @transform_2(%arg0: i32, %arg1: i32, %arg2: i32) -> (i32, i32) {
    %c0_i32 = arith.constant 0 : i32
    %c0_i32_0 = arith.constant 0 : i32
    return %c0_i32, %arg1 : i32, i32
  }
  func.func @transform_3(%arg0: i32, %arg1: i32, %arg2: i32) -> (i32, i32) {
    %c0_i32 = arith.constant 0 : i32
    return %arg0, %arg1 : i32, i32
  }
}

</mosaic_0001>

<bundles_post_ra>
// kernel: tpu_custom_call.1
= control target key start
LH: loop header
LB: loop body
LE: loop exit
PB: predicated region body
PF: predicated region fallthrough
CT: control target
= control target key end

     0   :  { %s2100_s0 = inlined_call_operand.hbm [shape: f32[512,512], index: 0, kind: input, shape index: {}]   ;;  %s2101_s1 = inlined_call_operand.hbm [shape: bf16[512,1536], index: 1, kind: input, shape index: {}]   ;;  %s2102_s2 = inlined_call_operand.hbm [shape: f32[1,1536], index: 2, kind: input, shape index: {}]   ;;  %s2103_s3 = inlined_call_operand.hbm [shape: bf16[512,1536], index: 3, kind: output, shape index: {}]  }
   0x1   :  { %2120 = sst [smem:[#allocation30_spill]] %s2100_s0 }
   0x2   :  { %2121 = sst [smem:[#allocation31_spill]] %s2101_s1 }
   0x3   :  { %2122 = sst [smem:[#allocation32_spill]] %s2102_s2 }
   0x4   :  { %2123 = sst [smem:[#allocation33_spill]] %s2103_s3 }
   0x5   :  { %8 = vsyncpa [#allocation4], 0 }
   0x6   :  { %10 = vsyncpa [#allocation4 + $0x1], 0 }
   0x7   :  { %11 = vsyncpa [#allocation7], 0 }
   0x8   :  { %13 = vsyncpa [#allocation7 + $0x1], 0 }
   0x9   :  { %14 = vsyncpa [#allocation5], 0 }
   0xa   :  { %16 = vsyncpa [#allocation5 + $0x1], 0  ;;  %s1631_s12 = smov 0   ;;  %s1633_s13 = smov 0  }
   0xb   :  { %s1635_s14 = smov 0   ;;  %s1637_s15 = smov 0  }
   0xc   :  { %s1639_s16 = smov 0   ;;  %s1641_s17 = smov 0  }
   0xd   :  { %s1643_s18 = smov 0   ;;  %s1645_s19 = smov 0  }
   0xe   :  { %s1647_s20 = smov 0   ;;  %s1649_s21 = smov 0  }
   0xf   :  { %s1651_s22 = smov 0   ;;  %s1653_s23 = smov 0  }
  0x10   :  { %s1655_s24 = smov 0   ;;  %s1657_s25 = smov 0  }
  0x11   :  { %s1659_s26 = smov 0   ;;  %s1661_s27 = smov 0  }
  0x12   :  { %s1663_s28 = smov 0   ;;  %s1665_s29 = smov 0  }
  0x13   :  { %s1667_s30 = smov 0  }
  0x14 LB: > { %2124 = sst [smem:[#allocation14_spill]] %s1523_s12  ;;  %s34_s4 = sadd.s32 1, %s1583_s27  ;;  %s1595_s30 = sphi %s1667_s30, %s22_s30   ;;  %s1591_s29 = sphi %s1665_s29, %s2199_s29   ;;  %s1587_s28 = sphi %s1663_s28, %s2186_s28   ;;  %s1583_s27 = sphi %s1661_s27, %s2198_s27   ;;  %s1579_s26 = sphi %s1659_s26, %s2197_s26   ;;  %s1575_s25 = sphi %s1657_s25, %s2184_s25   ;;  %s1571_s24 = sphi %s1655_s24, %s2196_s24   ;;  %s1567_s23 = sphi %s1653_s23, %s2195_s23   ;;  %s1563_s22 = sphi %s1651_s22, %s2194_s22   ;;  %s1559_s21 = sphi %s1649_s21, %s2193_s21   ;;  %s1555_s20 = sphi %s1647_s20, %s2192_s20   ;;  %s1551_s19 = sphi %s1645_s19, %s2181_s19   ;;  %s1547_s18 = sphi %s1643_s18, %s2180_s18   ;;  %s1543_s17 = sphi %s1641_s17, %s2191_s17   ;;  %s1539_s16 = sphi %s1639_s16, %s2190_s16   ;;  %s1535_s15 = sphi %s1637_s15, %s2189_s15   ;;  %s1531_s14 = sphi %s1635_s14, %s2188_s14   ;;  %s1527_s13 = sphi %s1633_s13, %s2187_s13   ;;  %s1523_s12 = sphi %s1631_s12, %s2179_s12  }
  0x15   : > { %2125 = sst [smem:[#allocation15_spill]] %s1527_s13  ;;  %s37_s5 = sadd.s32 1, %s1587_s28 }
  0x16   : > { %2126 = sst [smem:[#allocation16_spill]] %s1535_s15  ;;  %p35_p0 = scmp.ge.s32.totalorder %s34_s4, 2 }
  0x17   : > { %2127 = sst [smem:[#allocation17_spill]] %s1547_s18  ;;  %p2116_p1 = scmp.eq.s32.totalorder %s1595_s30, 0 }
  0x18   : > { %2128 = sst [smem:[#allocation18_spill]] %s1551_s19  ;;  %s78_s6 = sadd.s32 1, %s1555_s20 }
  0x19   : > { %2129 = sst [smem:[#allocation19_spill]] %s1555_s20  ;;  %p85_p2 = scmp.ne.s32.totalorder %s1555_s20, %s1551_s19 }
  0x1a   : > { %2130 = sst [smem:[#allocation20_spill]] %s1559_s21  ;;  %s2201_s4 = smov (%p35_p0, %s34_s4), 0 }
  0x1b   : > { %2131 = sst [smem:[#allocation21_spill]] %s1571_s24  ;;  %s2203_s5 = smov (!%p35_p0, %s37_s5), %s1587_s28 }
  0x1c   : > { %2132 = sst [smem:[#allocation22_spill]] %s1575_s25  ;;  %s1739_s7 = ssub.s32 %s1583_s27, %s2201_s4 }
  0x1d   : > { %2133 = sst [smem:[#allocation23_spill]] %s1579_s26  ;;  %p1743_p3 = por %p85_p2, %p2116_p1 }
  0x1e   : > { %2134 = sst [smem:[#allocation24_spill]] %s1587_s28  ;;  %p39_p4 = scmp.ge.s32.totalorder %s2203_s5, 12 }
  0x1f   : > { %2135 = sst [smem:[#allocation25_spill]] %s2201_s4  ;;  %p91_p5 = scmp.ne.s32.totalorder %s1551_s19, %s1547_s18 }
  0x20   : > { %p2117_p6 = scmp.lt.s32.totalorder %s1595_s30, 96  ;;  %s193_s10 = sand.u32 1, %s1595_s30  }
  0x21   : > { %s1754_s9 = scalar_select %p39_p4, 0, %s2203_s5  }
  0x22   : > { %s195_s11 = sand.u32 1, %s1555_s20   ;;  %s1115_s26 = smul.u32 384, %s1583_s27 }
  0x23   : > { %2137 = sst [smem:[#allocation26_spill]] %s1754_s9  ;;  %s1760_s4 = ssub.s32 %s1587_s28, %s1754_s9 }
  0x24   : > { %s75_s3 = sor.u32 %s1760_s4, %s1739_s7  ;;  %s921_s25 = sshll.u32 %s195_s11, 7 }
  0x25   : > { %p76_p7 = scmp.eq.s32.totalorder %s75_s3, 0  ;;  %s197_s24 = scalar_lea.vmem [#allocation6], %s921_s25 }
  0x26   : > { %s206_s2 = sshll.u32 %s197_s24, 4  ;;  %s203_s13 = sadd.s32 %s1587_s28, %s1115_s26  ;;  %s207_s2 = int_to_ptr.vmem [resolvable:$true] %s206_s2 }
  0x27   : > { %s1766_s12 = scalar_select %p76_p7, %s1555_s20, %s78_s6  }
  0x28   : > { %s924_s15 = sshll.u32 %s203_s13, 6  ;;  %p1773_p8 = pnand %p2117_p6, %p1743_p3 }
  0x29   : > { %2138 = sst [smem:[#allocation27_spill]] %s1766_s12  ;;  %p926_p9 = scmp.ge.s32.totalorder %s1595_s30, 1 }
  0x2a   : > { %s2140_s1 = sld [smem:[#allocation31_spill]]  ;;  %s1781_s3 = scalar_lea.sflag [#allocation7], %s193_s10 }
  0x2b   : > { %2141 = sst [smem:[#allocation28_spill]] %s1781_s3  ;;  %p1321_p10 = pneg %p1773_p8 }
  0x2c   : > { %s1332_s24 = scalar_lea.vmem %s207_s2, 2048  ;;  %s1597_s13 = smov [#allocation6]  }
  0x2d   : > { %p1333_p11 = scmp.ne.s32.totalorder %s207_s2, %s1332_s24  ;;  %s1337_s25 = sshll.u32 %s1597_s13, 4  ;;  %s1338_s25 = int_to_ptr.vmem [resolvable:$false] %s1337_s25 }
  0x2e   : > { %s1339_s26 = scalar_lea.vmem %s1338_s25, 4096  ;;  %p1340_p0 = scmp.lt.s32.totalorder %s207_s2, %s1338_s25 }
  0x2f   : > { %p1335_p12 = pnand %p1333_p11, %p1321_p10  ;;  %p1341_p2 = scmp.lt.s32.totalorder %s1339_s26, %s1332_s24 }
  0x30   : > { %s205_s11 = scalar_lea.hbm %s2140_s1, %s924_s15 }
  0x31   : > { %p1336_p13 = pneg %p1335_p12  ;;  %p1342_p3 = por %p1341_p2, %p1340_p0 }
  0x33   : > { %p1343_p7 = pnand %p1342_p3, %p1336_p13 }
  0x35   : > { %1346 = shalt.err (!%p1343_p7)
}
  0x36   : > { %s1598_s19 = smov 768   ;;  %s1599_s15 = smov 64  }
  0x37   : > { %s1600_s6 = smov 4   ;;  %p231_p10 = scmp.lt.s32.totalorder %s1595_s30, 97 }
  0x38   : > { %1131 = dma.hbm_to_vmem [thread:$0]  (!%p1773_p8), %s205_s11, 2048, %s207_s2, %s1781_s3, %s1598_s19, %s1599_s15, %s1600_s6  }
  0x39   : > { %p1791_p11 = pnand %p926_p9, %p231_p10  ;;  %s41_s9 = sadd.s32 1, %s1591_s29 }
  0x3a   : > { %s50_s10 = sadd.s32 1, %s1567_s23  ;;  %s2205_s9 = smov (!%p39_p4, %s41_s9), %s1591_s29 }
  0x3b   : > { %s2142_s8 = scalar_select %p1791_p11, 1, 0 }
  0x3c   : > { %p57_p12 = scmp.ne.s32.totalorder %s1567_s23, %s1563_s22  ;;  %p63_p13 = scmp.ne.s32.totalorder %s1563_s22, %s1559_s21 }
  0x3d   : > { %2143 = sst [smem:[#allocation29_spill]] %s2142_s8  ;;  %p43_p0 = scmp.ge.s32.totalorder %s2205_s9, 4 }
  0x3e   : > { %s132_s18 = sadd.s32 1, %s1531_s14  ;;  %p1807_p8 = por %p2116_p1, %p57_p12 }
  0x3f   : > { %s169_s11 = sand.u32 1, %s1567_s23   ;;  %s2207_s9 = smov (%p43_p0, %s2205_s9), 0 }
  0x40   : > { %s916_s24 = sshll.u32 %s169_s11, 8  ;;  %s45_s5 = ssub.s32 %s1591_s29, %s2207_s9 }
  0x41   : > { %s47_s13 = sor.u32 %s1739_s7, %s45_s5  ;;  %s129_s25 = sor.u32 %s1760_s4, %s45_s5 }
  0x42   : > { %p48_p4 = scmp.eq.s32.totalorder %s47_s13, 0  ;;  %p130_p9 = scmp.eq.s32.totalorder %s129_s25, 0 }
  0x43   : > { %s918_s26 = sshll.u32 %s1583_s27, 1  ;;  %s971_s19 = sshll.u32 %s1591_s29, 6 }
  0x44   : > { %s1821_s15 = scalar_select %p48_p4, %s1567_s23, %s50_s10  }
  0x45   : > { %s1824_s6 = scalar_select %p130_p9, %s1531_s14, %s132_s18  }
  0x46   : > { %s180_s1 = sadd.s32 %s971_s19, %s918_s26  ;;  %s173_s12 = scalar_lea.vmem [#allocation3], %s916_s24 }
  0x47   : > { %s183_s20 = sshll.u32 %s173_s12, 4  ;;  %s920_s8 = sshll.u32 %s180_s1, 7  ;;  %s184_s20 = int_to_ptr.vmem [resolvable:$true] %s183_s20 }
  0x48   : > { %s2145_s0 = sld [smem:[#allocation30_spill]]  ;;  %p1833_p2 = pnand %p2117_p6, %p1807_p8 }
  0x49   : > { %s170_s10 = scalar_lea.sflag [#allocation4], %s169_s11  ;;  %s1360_s18 = scalar_lea.vmem %s184_s20, 4096 }
  0x4a   : > { %p1349_p3 = pneg %p1833_p2  ;;  %p1361_p7 = scmp.ne.s32.totalorder %s184_s20, %s1360_s18 }
  0x4b   : > { %s1601_s1 = smov [#allocation3]  }
  0x4c   : > { %p1363_p10 = pnand %p1361_p7, %p1349_p3  ;;  %s1365_s12 = sshll.u32 %s1601_s1, 4  ;;  %s1366_s12 = int_to_ptr.vmem [resolvable:$false] %s1365_s12 }
  0x4d   : > { %s1367_s24 = scalar_lea.vmem %s1366_s12, 8192  ;;  %p1368_p0 = scmp.lt.s32.totalorder %s184_s20, %s1366_s12 }
  0x4e   : > { %s182_s21 = scalar_lea.hbm %s2145_s0, %s920_s8  ;;  %p1364_p12 = pneg %p1363_p10 }
  0x4f   : > { %p1369_p4 = scmp.lt.s32.totalorder %s1367_s24, %s1360_s18 }
  0x51   : > { %p1370_p9 = por %p1369_p4, %p1368_p0 }
  0x53   : > { %p1371_p1 = pnand %p1370_p9, %p1364_p12 }
  0x55   : > { %1374 = shalt.err (!%p1371_p1)
}
  0x56   : > { %s1602_s28 = smov 512   ;;  %s2150_s11 = sld [smem:[#allocation16_spill]] }
  0x57   : > { %s2151_s5 = sld [smem:[#allocation15_spill]]  ;;  %s1603_s13 = smov 256  }
  0x58   : > { %s1604_s25 = smov 16   ;;  %s2152_s26 = sld [smem:[#allocation14_spill]] }
  0x59   : > { %1128 = dma.hbm_to_vmem [thread:$0]  (!%p1833_p2), %s182_s21, 4096, %s184_s20, %s170_s10, %s1602_s28, %s1603_s13, %s1604_s25  }
  0x5a   : > { %s1842_s19 = sadd.s32 4294967295, %s1595_s30   ;;  %s913_s18 = sadd.s32 4294967294, %s1595_s30  }
  0x5b   : > { %p64_p1 = scmp.eq.s32.totalorder %s1842_s19, 0  ;;  %s2153_s1 = sld [smem:[#allocation24_spill]] }
  0x5c   : > { %p102_p8 = scmp.eq.s32.totalorder %s1760_s4, 0  ;;  %s104_s12 = sadd.s32 1, %s1543_s17 }
  0x5d   : > { %p111_p3 = scmp.ne.s32.totalorder %s1543_s17, %s1539_s16  ;;  %p1853_p7 = por %p64_p1, %p63_p13 }
  0x5e   : > { %p1860_p10 = por %p91_p5, %p64_p1  ;;  %p2156_p2 = scmp.eq.s32.totalorder %s1595_s30, 0 }
  0x5f   : > { %s1865_s20 = scalar_select %p102_p8, %s1543_s17, %s104_s12  }
  0x60   : > { %p1869_p12 = por %p111_p3, %p2156_p2  ;;  %p117_p0 = scmp.ne.s32.totalorder %s1539_s16, %s2150_s11 }
  0x61   : > { %p142_p4 = scmp.ne.s32.totalorder %s1531_s14, %s2151_s5  ;;  %p143_p13 = scmp.eq.s32.totalorder %s1842_s19, 95 }
  0x62   : > { %p1878_p9 = por %p117_p0, %p64_p1  ;;  %p148_p5 = scmp.ne.s32.totalorder %s2151_s5, %s2152_s26 }
  0x63   : > { %p1884_p6 = por %p143_p13, %p142_p4  ;;  %p149_p8 = scmp.eq.s32.totalorder %s913_s18, 95 }
  0x64   : > { %s2158_s4 = scalar_select %p1878_p9, 1, 0 }
  0x65   : > { %s2159_s10 = scalar_select %p1884_p6, 1, 0 }
  0x66   : > { %s218_s28 = sand.u32 1, %s1543_s17   ;;  %s925_s3 = sshll.u32 %s2153_s1, 4 }
  0x67   : > { %p1890_p3 = por %p149_p8, %p148_p5  ;;  %s2161_s13 = sld [smem:[#allocation32_spill]] }
  0x68   : > { %s219_s12 = scalar_lea.vmem [#allocation8], %s218_s28  ;;  %p2162_p1 = scmp.lt.s32.totalorder %s1595_s30, 96 }
  0x69   : > { %s2160_s8 = scalar_select %p1890_p3, 1, 0 }
  0x6a   : > { %s226_s0 = sshll.u32 %s219_s12, 4  ;;  %p1901_p2 = pnand %p2162_p1, %p1869_p12  ;;  %s227_s0 = int_to_ptr.vmem [resolvable:$true] %s226_s0 }
  0x6b   : > { %s1388_s26 = scalar_lea.vmem %s227_s0, 16  ;;  %s1605_s18 = smov [#allocation8]  }
  0x6c   : > { %p1377_p0 = pneg %p1901_p2  ;;  %p1389_p4 = scmp.ne.s32.totalorder %s227_s0, %s1388_s26 }
  0x6d   : > { %s224_s25 = scalar_lea.hbm %s2161_s13, %s925_s3  ;;  %s1393_s1 = sshll.u32 %s1605_s18, 4  ;;  %s1394_s1 = int_to_ptr.vmem [resolvable:$false] %s1393_s1 }
  0x6e   : > { %p1391_p13 = pnand %p1389_p4, %p1377_p0  ;;  %s1395_s3 = scalar_lea.vmem %s1394_s1, 32 }
  0x6f   : > { %p1396_p8 = scmp.lt.s32.totalorder %s227_s0, %s1394_s1  ;;  %p1397_p3 = scmp.lt.s32.totalorder %s1395_s3, %s1388_s26 }
  0x70   : > { %p1392_p5 = pneg %p1391_p13 }
  0x71   : > { %p1398_p6 = por %p1397_p3, %p1396_p8 }
  0x73   : > { %p1399_p9 = pnand %p1398_p6, %p1392_p5 }
  0x75   : > { %1402 = shalt.err (!%p1399_p9)
}
  0x76   : > { %s2164_s21 = sld [smem:[#allocation28_spill]]  ;;  %s237_s2 = sand.u32 (!%p1791_p11), 1, %s1563_s22  }
  0x77   : > { %s927_s11 = sshll.u32 (!%p1791_p11), %s237_s2, 8  ;;  %s238_s13 = scalar_lea.sflag (!%p1791_p11), [#allocation4], %s237_s2 }
  0x78   : > { %235 = sbr.rel (%p1791_p11) target bundleno = 464 (0x1d0), region = 32  ;;  %s1913_s12 = scalar_lea.vmem (!%p1791_p11), [#allocation3], %s927_s11 }
  0x7c   : > { %1134 = dma.hbm_to_vmem [thread:$0]  (!%p1901_p2), %s224_s25, 16, %s227_s0, %s2164_s21  }
  0x7d   : > { %1506 = dma.done.wait (%p1853_p7), %s238_s13, 4096  }
  0x7e   : > { %1508 = vsyncadd (%p1853_p7), %s238_s13, 4294963200  ;;  %s2166_s26 = sld [smem:[#allocation18_spill]]  ;;  %s246_s5 = sand.u32 1, %s1842_s19  }
  0x7f   : > { %s247_s18 = scalar_lea.sflag [#allocation7], %s246_s5 }
  0x84   : > { %s248_s0 = sand.u32 1, %s2166_s26  }
  0x85   : > { %s928_s25 = sshll.u32 %s248_s0, 7 }
  0x86   : > { %s1921_s1 = scalar_lea.vmem [#allocation6], %s928_s25 }
  0x87   : > { %1510 = dma.done.wait (%p1860_p10), %s247_s18, 2048  }
  0x88   : > { %1512 = vsyncadd (%p1860_p10), %s247_s18, 4294965248  ;;  %s257_s3 = sand.u32 1, %s1539_s16   ;;  %p2167_p6 = scmp.ne.s32.totalorder %s2158_s4, 0 }
  0x89   : > { %s1928_s21 = scalar_lea.vmem [#allocation8], %s257_s3 }
  0x8a   : > { %1514 = dma.done.wait (%p2167_p6), %s247_s18, 16  }
  0x8b   : > { %1516 = vsyncadd (%p2167_p6), %s247_s18, 4294967280  ;;  %s2168_s19 = sld [smem:[#allocation15_spill]] }
  0x8c   : > { %s2169_s11 = sld [smem:[#allocation21_spill]] }
  0x91   : > { %s287_s24 = sand.u32 1, %s2168_s19  }
  0x92   : > { %s929_s28 = sshll.u32 %s287_s24, 6  ;;  %p930_p11 = scmp.ne.s32.totalorder %s2169_s11, 0 }
  0x93   : > { %s1937_s2 = scalar_lea.vmem [#allocation9], %s929_s28 }
  0x94   : > { %298 = sbr.rel (%p930_p11) target bundleno = 162 (0xa2), region = 48 }
  0x99   : > { %v1606_v0 = vmov 0.0  }
  0x9a   : > { %299 = vst [vmem:[#allocation2 + $0x30] sm:$0xff] %v1606_v0  ;;  %300 = vst [vmem:[#allocation2] sm:$0xff] %v1606_v0 }
  0x9b   : > { %301 = vst [vmem:[#allocation2 + $0x58] sm:$0xff] %v1606_v0  ;;  %302 = vst [vmem:[#allocation2 + $0x18] sm:$0xff] %v1606_v0 }
  0x9c   : > { %303 = vst [vmem:[#allocation2 + $0x50] sm:$0xff] %v1606_v0  ;;  %304 = vst [vmem:[#allocation2 + $0x68] sm:$0xff] %v1606_v0 }
  0x9d   : > { %305 = vst [vmem:[#allocation2 + $0x8] sm:$0xff] %v1606_v0  ;;  %306 = vst [vmem:[#allocation2 + $0x48] sm:$0xff] %v1606_v0 }
  0x9e   : > { %307 = vst [vmem:[#allocation2 + $0x40] sm:$0xff] %v1606_v0  ;;  %308 = vst [vmem:[#allocation2 + $0x20] sm:$0xff] %v1606_v0 }
  0x9f   : > { %309 = vst [vmem:[#allocation2 + $0x10] sm:$0xff] %v1606_v0  ;;  %310 = vst [vmem:[#allocation2 + $0x38] sm:$0xff] %v1606_v0 }
  0xa0   : > { %311 = vst [vmem:[#allocation2 + $0x60] sm:$0xff] %v1606_v0  ;;  %312 = vst [vmem:[#allocation2 + $0x70] sm:$0xff] %v1606_v0 }
  0xa1   : > { %313 = vst [vmem:[#allocation2 + $0x78] sm:$0xff] %v1606_v0  ;;  %314 = vst [vmem:[#allocation2 + $0x28] sm:$0xff] %v1606_v0 }
  0xa2 PF: > { %v1303_v1 = vld [vmem:[%s1921_s1 + $0x78] sm:$0xff]   ;;  %v1305_v3 = vld [vmem:[%s1921_s1 + $0x70] sm:$0xff]   ;;  %v1307_v5 = vld [vmem:[%s1921_s1 + $0x68] sm:$0xff]   ;;  %s2170_s7 = sld [smem:[#allocation21_spill]] }
  0xa3   : > { %v1304_v2 = vld [vmem:[%s1921_s1 + $0x38] sm:$0xff]   ;;  %1035 = vmatprep.subr.bf16.mxu0 %v1303_v1  ;;  %1099 = vmatprep.subr.bf16.mxu1 %v1303_v1  ;;  %v1306_v4 = vld [vmem:[%s1921_s1 + $0x30] sm:$0xff]   ;;  %v1308_v6 = vld [vmem:[%s1921_s1 + $0x28] sm:$0xff]  }
  0xa4   : > { %1036 = vmatpush3.bf16.msra.mxu0 %v1304_v2  ;;  %1107 = vmatpush3.bf16.msra.mxu1 %v1304_v2  ;;  %v1309_v7 = vld [vmem:[%s1921_s1 + $0x60] sm:$0xff]   ;;  %v1311_v9 = vld [vmem:[%s1921_s1 + $0x58] sm:$0xff]   ;;  %v1313_v11 = vld [vmem:[%s1921_s1 + $0x50] sm:$0xff]  }
  0xa5   : > { %1037 = vmatprep.subr.bf16.mxu0 %v1305_v3  ;;  %1100 = vmatprep.subr.bf16.mxu1 %v1305_v3  ;;  %v1310_v8 = vld [vmem:[%s1921_s1 + $0x20] sm:$0xff]   ;;  %v1312_v10 = vld [vmem:[%s1921_s1 + $0x18] sm:$0xff]   ;;  %v332_v12 = vld [vmem:[%s1913_s12 + $0x8] sm:$0xff] }
  0xa6   : > { %v334_v13 = vld [vmem:[%s1913_s12 + $0x18] sm:$0xff]  ;;  %v348_v14 = vld [vmem:[%s1913_s12 + $0x88] sm:$0xff]  ;;  %v1314_v18 = vld [vmem:[%s1921_s1 + $0x10] sm:$0xff]  }
  0xa7   : > { %v364_v15 = vpack.c.bf16 %v334_v13, %v332_v12  ;;  %v350_v16 = vld [vmem:[%s1913_s12 + $0x98] sm:$0xff]  ;;  %v1315_v19 = vld [vmem:[%s1921_s1 + $0x48] sm:$0xff]   ;;  %v1317_v21 = vld [vmem:[%s1921_s1 + $0x40] sm:$0xff]  }
  0xa8   : > { %1038 = vmatpush3.bf16.msra.mxu0 %v1306_v4  ;;  %1108 = vmatpush3.bf16.msra.mxu1 %v1306_v4  ;;  %v372_v17 = vpack.c.bf16 %v350_v16, %v348_v14  ;;  %v1316_v20 = vld [vmem:[%s1921_s1 + $0x8] sm:$0xff]   ;;  %v1318_v22 = vld [vmem:[%s1921_s1] sm:$0xff]   ;;  %v333_v24 = vld [vmem:[%s1913_s12 + $0x10] sm:$0xff]  ;;  %p947_p7 = scmp.ne.s32.totalorder %s2170_s7, 1 }
  0xa9   : > { %1039 = vmatprep.subr.bf16.mxu0 %v1307_v5  ;;  %1101 = vmatprep.subr.bf16.mxu1 %v1307_v5  ;;  %v331_v23 = vld [vmem:[%s1913_s12] sm:$0xff]  ;;  %v349_v26 = vld [vmem:[%s1913_s12 + $0x90] sm:$0xff]  ;;  %v336_v27 = vld [vmem:[%s1913_s12 + $0x28] sm:$0xff] }
  0xaa   : > { %539 = vmatprep.mubr.bf16.mxu0 %v364_v15  ;;  %571 = vmatprep.mubr.bf16.mxu1 %v372_v17  ;;  %v347_v25 = vld [vmem:[%s1913_s12 + $0x80] sm:$0xff]  ;;  %v338_v28 = vld [vmem:[%s1913_s12 + $0x38] sm:$0xff]  ;;  %v352_v29 = vld [vmem:[%s1913_s12 + $0xa8] sm:$0xff]  ;;  %v363_v31 = vpack.c.bf16 %v333_v24, %v331_v23 }
  0xab   : > { %v354_v30 = vld [vmem:[%s1913_s12 + $0xb8] sm:$0xff]  ;;  %v371_v32 = vpack.c.bf16 %v349_v26, %v347_v25  ;;  %v366_v33 = vpack.c.bf16 %v338_v28, %v336_v27  ;;  %v335_v35 = vld [vmem:[%s1913_s12 + $0x20] sm:$0xff]  ;;  %v337_v36 = vld [vmem:[%s1913_s12 + $0x30] sm:$0xff] }
  0xac   : > { %1040 = vmatpush3.bf16.msra.mxu0 %v1308_v6  ;;  %1109 = vmatpush3.bf16.msra.mxu1 %v1308_v6  ;;  %v374_v34 = vpack.c.bf16 %v354_v30, %v352_v29  ;;  %v351_v37 = vld [vmem:[%s1913_s12 + $0xa0] sm:$0xff]  ;;  %v353_v38 = vld [vmem:[%s1913_s12 + $0xb0] sm:$0xff]  ;;  %v340_v39 = vld [vmem:[%s1913_s12 + $0x48] sm:$0xff]  ;;  %v365_v43 = vpack.c.bf16 %v337_v36, %v335_v35 }
  0xad   : > { %1041 = vmatprep.subr.bf16.mxu0 %v1309_v7  ;;  %1102 = vmatprep.subr.bf16.mxu1 %v1309_v7  ;;  %v342_v40 = vld [vmem:[%s1913_s12 + $0x58] sm:$0xff]  ;;  %v356_v41 = vld [vmem:[%s1913_s12 + $0xc8] sm:$0xff]  ;;  %v373_v44 = vpack.c.bf16 %v353_v38, %v351_v37  ;;  %v339_v47 = vld [vmem:[%s1913_s12 + $0x40] sm:$0xff] }
  0xae   : > { %v358_v42 = vld [vmem:[%s1913_s12 + $0xd8] sm:$0xff]  ;;  %v368_v45 = vpack.c.bf16 %v342_v40, %v340_v39  ;;  %v341_v48 = vld [vmem:[%s1913_s12 + $0x50] sm:$0xff]  ;;  %v355_v49 = vld [vmem:[%s1913_s12 + $0xc0] sm:$0xff] }
  0xaf   : > { %v376_v46 = vpack.c.bf16 %v358_v42, %v356_v41  ;;  %v357_v50 = vld [vmem:[%s1913_s12 + $0xd0] sm:$0xff]  ;;  %v344_v51 = vld [vmem:[%s1913_s12 + $0x68] sm:$0xff]  ;;  %v346_v52 = vld [vmem:[%s1913_s12 + $0x78] sm:$0xff]  ;;  %v367_v55 = vpack.c.bf16 %v341_v48, %v339_v47 }
  0xb0   : > { %1042 = vmatpush3.bf16.msra.mxu0 %v1310_v8  ;;  %1110 = vmatpush3.bf16.msra.mxu1 %v1310_v8  ;;  %v360_v53 = vld [vmem:[%s1913_s12 + $0xe8] sm:$0xff]  ;;  %v362_v54 = vld [vmem:[%s1913_s12 + $0xf8] sm:$0xff]  ;;  %v375_v56 = vpack.c.bf16 %v357_v50, %v355_v49  ;;  %v370_v57 = vpack.c.bf16 %v346_v52, %v344_v51  ;;  %v343_v59 = vld [vmem:[%s1913_s12 + $0x60] sm:$0xff] }
  0xb1   : > { %1043 = vmatprep.subr.bf16.mxu0 %v1311_v9  ;;  %1103 = vmatprep.subr.bf16.mxu1 %v1311_v9  ;;  %v378_v58 = vpack.c.bf16 %v362_v54, %v360_v53  ;;  %v345_v60 = vld [vmem:[%s1913_s12 + $0x70] sm:$0xff]  ;;  %v359_v61 = vld [vmem:[%s1913_s12 + $0xe0] sm:$0xff]  ;;  %v317_v23 = vld [vmem:[#allocation2 + $0x58] sm:$0xff] }
  0xb2   : > { %v361_v62 = vld [vmem:[%s1913_s12 + $0xf0] sm:$0xff]  ;;  %v369_v63 = vpack.c.bf16 %v345_v60, %v343_v59  ;;  %v323_v5 = vld [vmem:[#allocation2 + $0x40] sm:$0xff]  ;;  %v326_v35 = vld [vmem:[#allocation2 + $0x38] sm:$0xff] }
  0xb3   : > { %v377_v0 = vpack.c.bf16 %v361_v62, %v359_v61  ;;  %v315_v3 = vld [vmem:[#allocation2 + $0x30] sm:$0xff]  ;;  %v316_v13 = vld [vmem:[#allocation2] sm:$0xff]  ;;  %v320_v53 = vld [vmem:[#allocation2 + $0x68] sm:$0xff] }
  0xb4   : > { %1044 = vmatpush3.bf16.msra.mxu0 %v1312_v10  ;;  %1111 = vmatpush3.bf16.msra.mxu1 %v1312_v10  ;;  %v324_v15 = vld [vmem:[#allocation2 + $0x20] sm:$0xff]  ;;  %v325_v25 = vld [vmem:[#allocation2 + $0x10] sm:$0xff] }
  0xb5   : > { %1045 = vmatprep.subr.bf16.mxu0 %v1313_v11  ;;  %1104 = vmatprep.subr.bf16.mxu1 %v1313_v11 }
  0xb8   : > { %1046 = vmatpush3.bf16.msra.mxu0 %v1314_v18  ;;  %1112 = vmatpush3.bf16.msra.mxu1 %v1314_v18 }
  0xb9   : > { %1047 = vmatprep.subr.bf16.mxu0 %v1315_v19  ;;  %1105 = vmatprep.subr.bf16.mxu1 %v1315_v19 }
  0xbc   : > { %1048 = vmatpush3.bf16.msra.mxu0 %v1316_v20  ;;  %1113 = vmatpush3.bf16.msra.mxu1 %v1316_v20 }
  0xbd   : > { %1049 = vmatprep.subr.bf16.mxu0 %v1317_v21  ;;  %1106 = vmatprep.subr.bf16.mxu1 %v1317_v21 }
  0xc0   : > { %1050 = vmatpush3.bf16.msra.mxu0 %v1318_v22  ;;  %1114 = vmatpush3.bf16.msra.mxu1 %v1318_v22 }
  0xc3   : > { %540 = vmatmul.mubr.bf16.vlgmr.msra.gmra.mxu0 %v363_v31  ;;  %572 = vmatmul.mubr.bf16.vlgmr.msra.gmra.mxu1 %v371_v32 }
  0xc4   : > { %547 = vmatprep.mubr.bf16.mxu0 %v366_v33  ;;  %579 = vmatprep.mubr.bf16.mxu1 %v374_v34  ;;  %v318_v33 = vld [vmem:[#allocation2 + $0x18] sm:$0xff] }
  0xcb   : > { %548 = vmatmul.mubr.bf16.gmra.mxu0 %v365_v43  ;;  %580 = vmatmul.mubr.bf16.gmra.mxu1 %v373_v44  ;;  %v319_v43 = vld [vmem:[#allocation2 + $0x50] sm:$0xff] }
  0xcc   : > { %555 = vmatprep.mubr.bf16.mxu0 %v368_v45  ;;  %587 = vmatprep.mubr.bf16.mxu1 %v376_v46  ;;  %v327_v45 = vld [vmem:[#allocation2 + $0x60] sm:$0xff] }
  0xd3   : > { %556 = vmatmul.mubr.bf16.gmra.mxu0 %v367_v55  ;;  %588 = vmatmul.mubr.bf16.gmra.mxu1 %v375_v56  ;;  %v328_v55 = vld [vmem:[#allocation2 + $0x70] sm:$0xff] }
  0xd4   : > { %563 = vmatprep.mubr.bf16.mxu0 %v370_v57  ;;  %595 = vmatprep.mubr.bf16.mxu1 %v378_v58 }
  0xdb   : > { %564 = vmatmul.mubr.bf16.gmra.mxu0 %v369_v63  ;;  %596 = vmatmul.mubr.bf16.gmra.mxu1 %v377_v0  ;;  %v321_v63 = vld [vmem:[#allocation2 + $0x8] sm:$0xff] }
 0x183   : > { %v1051_v1 = vpop.f32.mrf.mxu0  ;;  %v1075_v2 = vpop.f32.mrf.mxu1 }
 0x185   : > { %v1052_v4 = vpop.f32.mrf.mxu0  ;;  %v1076_v6 = vpop.f32.mrf.mxu1 }
 0x186   : > { %v1053_v7 = vadd.f32 %v1052_v4, %v1051_v1  ;;  %v1077_v8 = vadd.f32 %v1076_v6, %v1075_v2  ;;  %v329_v1 = vld [vmem:[#allocation2 + $0x78] sm:$0xff] }
 0x187   : > { %v1054_v9 = vpop.f32.mrf.mxu0  ;;  %v1078_v10 = vpop.f32.mrf.mxu1 }
 0x188   : > { %v604_v11 = vadd.f32 %v1053_v7, %v315_v3  ;;  %v612_v12 = vadd.f32 %v1077_v8, %v323_v5 }
 0x189   : > { %v1055_v14 = vpop.f32.mrf.mxu0  ;;  %v1079_v16 = vpop.f32.mrf.mxu1 }
 0x18a   : > { %620 = vst [vmem:[#allocation2 + $0x30] sm:$0xff] %v604_v11  ;;  %628 = vst [vmem:[#allocation2 + $0x40] sm:$0xff] %v612_v12  ;;  %v1056_v17 = vadd.f32 %v1055_v14, %v1054_v9  ;;  %v1080_v18 = vadd.f32 %v1079_v16, %v1078_v10  ;;  %v322_v9 = vld [vmem:[#allocation2 + $0x48] sm:$0xff] }
 0x18b   : > { %v1057_v19 = vpop.f32.mrf.mxu0  ;;  %v1081_v20 = vpop.f32.mrf.mxu1  ;;  %v330_v11 = vld [vmem:[#allocation2 + $0x28] sm:$0xff] }
 0x18c   : > { %v605_v21 = vadd.f32 %v1056_v17, %v316_v13  ;;  %v613_v22 = vadd.f32 %v1080_v18, %v324_v15 }
 0x18d   : > { %v1058_v24 = vpop.f32.mrf.mxu0  ;;  %v1082_v26 = vpop.f32.mrf.mxu1 }
 0x18e   : > { %621 = vst [vmem:[#allocation2] sm:$0xff] %v605_v21  ;;  %629 = vst [vmem:[#allocation2 + $0x20] sm:$0xff] %v613_v22  ;;  %v1059_v27 = vadd.f32 %v1058_v24, %v1057_v19  ;;  %v1083_v28 = vadd.f32 %v1082_v26, %v1081_v20 }
 0x18f   : > { %v1060_v29 = vpop.f32.mrf.mxu0  ;;  %v1084_v30 = vpop.f32.mrf.mxu1 }
 0x190   : > { %v606_v31 = vadd.f32 %v1059_v27, %v317_v23  ;;  %v614_v32 = vadd.f32 %v1083_v28, %v325_v25 }
 0x191   : > { %v1061_v34 = vpop.f32.mrf.mxu0  ;;  %v1085_v36 = vpop.f32.mrf.mxu1 }
 0x192   : > { %622 = vst [vmem:[#allocation2 + $0x58] sm:$0xff] %v606_v31  ;;  %630 = vst [vmem:[#allocation2 + $0x10] sm:$0xff] %v614_v32  ;;  %v1062_v37 = vadd.f32 %v1061_v34, %v1060_v29  ;;  %v1086_v38 = vadd.f32 %v1085_v36, %v1084_v30 }
 0x193   : > { %v1063_v39 = vpop.f32.mrf.mxu0  ;;  %v1087_v40 = vpop.f32.mrf.mxu1 }
 0x194   : > { %v607_v41 = vadd.f32 %v1062_v37, %v318_v33  ;;  %v615_v42 = vadd.f32 %v1086_v38, %v326_v35 }
 0x195   : > { %v1064_v44 = vpop.f32.mrf.mxu0  ;;  %v1088_v46 = vpop.f32.mrf.mxu1 }
 0x196   : > { %623 = vst [vmem:[#allocation2 + $0x18] sm:$0xff] %v607_v41  ;;  %631 = vst [vmem:[#allocation2 + $0x38] sm:$0xff] %v615_v42  ;;  %v1065_v47 = vadd.f32 %v1064_v44, %v1063_v39  ;;  %v1089_v48 = vadd.f32 %v1088_v46, %v1087_v40 }
 0x197   : > { %v1066_v49 = vpop.f32.mrf.mxu0  ;;  %v1090_v50 = vpop.f32.mrf.mxu1 }
 0x198   : > { %v608_v51 = vadd.f32 %v1065_v47, %v319_v43  ;;  %v616_v52 = vadd.f32 %v1089_v48, %v327_v45 }
 0x199   : > { %v1067_v54 = vpop.f32.mrf.mxu0  ;;  %v1091_v56 = vpop.f32.mrf.mxu1 }
 0x19a   : > { %624 = vst [vmem:[#allocation2 + $0x50] sm:$0xff] %v608_v51  ;;  %632 = vst [vmem:[#allocation2 + $0x60] sm:$0xff] %v616_v52  ;;  %v1068_v57 = vadd.f32 %v1067_v54, %v1066_v49  ;;  %v1092_v58 = vadd.f32 %v1091_v56, %v1090_v50 }
 0x19b   : > { %v1069_v59 = vpop.f32.mrf.mxu0  ;;  %v1093_v60 = vpop.f32.mrf.mxu1 }
 0x19c   : > { %v609_v61 = vadd.f32 %v1068_v57, %v320_v53  ;;  %v617_v62 = vadd.f32 %v1092_v58, %v328_v55 }
 0x19d   : > { %v1070_v0 = vpop.f32.mrf.mxu0  ;;  %v1094_v2 = vpop.f32.mrf.mxu1 }
 0x19e   : > { %625 = vst [vmem:[#allocation2 + $0x68] sm:$0xff] %v609_v61  ;;  %633 = vst [vmem:[#allocation2 + $0x70] sm:$0xff] %v617_v62  ;;  %v1071_v3 = vadd.f32 %v1070_v0, %v1069_v59  ;;  %v1095_v4 = vadd.f32 %v1094_v2, %v1093_v60 }
 0x19f   : > { %v1072_v5 = vpop.f32.mrf.mxu0  ;;  %v1096_v6 = vpop.f32.mrf.mxu1 }
 0x1a0   : > { %v610_v7 = vadd.f32 %v1071_v3, %v321_v63  ;;  %v618_v8 = vadd.f32 %v1095_v4, %v329_v1 }
 0x1a1   : > { %v1073_v10 = vpop.f32.mrf.mxu0  ;;  %v1097_v12 = vpop.f32.mrf.mxu1 }
 0x1a2   : > { %626 = vst [vmem:[#allocation2 + $0x8] sm:$0xff] %v610_v7  ;;  %634 = vst [vmem:[#allocation2 + $0x78] sm:$0xff] %v618_v8  ;;  %v1074_v13 = vadd.f32 %v1073_v10, %v1072_v5  ;;  %v1098_v14 = vadd.f32 %v1097_v12, %v1096_v6  ;;  %639 = sbr.rel (%p947_p7) target bundleno = 436 (0x1b4), region = 52 }
 0x1a4   : > { %v611_v15 = vadd.f32 %v1074_v13, %v322_v9  ;;  %v619_v16 = vadd.f32 %v1098_v14, %v330_v11 }
 0x1a6   : > { %627 = vst [vmem:[#allocation2 + $0x48] sm:$0xff] %v611_v15  ;;  %635 = vst [vmem:[#allocation2 + $0x28] sm:$0xff] %v619_v16 }
 0x1a7   : > { %v640_v17 = vld [vmem:[#allocation2 + $0x30] sm:$0xff]  ;;  %v641_v18 = vld [vmem:[#allocation2] sm:$0xff]  ;;  %v642_v22 = vld [vmem:[#allocation2 + $0x58] sm:$0xff] }
 0x1a8   : > { %v948_v19 = vld [vmem:[%s1928_s21] ss:$0 sm:$0xff]  ;;  %v643_v23 = vld [vmem:[#allocation2 + $0x18] sm:$0xff]  ;;  %v644_v24 = vld [vmem:[#allocation2 + $0x50] sm:$0xff] }
 0x1a9   : > { %v663_v20 = vadd.f32 %v948_v19, %v640_v17  ;;  %v664_v21 = vadd.f32 %v948_v19, %v641_v18  ;;  %v665_v25 = vadd.f32 %v948_v19, %v642_v22  ;;  %v666_v26 = vadd.f32 %v948_v19, %v643_v23  ;;  %v645_v27 = vld [vmem:[#allocation2 + $0x68] sm:$0xff]  ;;  %v648_v35 = vld [vmem:[#allocation2 + $0x40] sm:$0xff]  ;;  %v650_v37 = vld [vmem:[#allocation2 + $0x10] sm:$0xff] }
 0x1aa   : > { %v667_v28 = vadd.f32 %v948_v19, %v644_v24  ;;  %v646_v29 = vld [vmem:[#allocation2 + $0x8] sm:$0xff]  ;;  %v668_v32 = vadd.f32 %v948_v19, %v645_v27  ;;  %v649_v36 = vld [vmem:[#allocation2 + $0x20] sm:$0xff]  ;;  %v671_v39 = vadd.f32 %v948_v19, %v648_v35  ;;  %v651_v41 = vld [vmem:[#allocation2 + $0x38] sm:$0xff]  ;;  %v673_v42 = vadd.f32 %v948_v19, %v650_v37 }
 0x1ab   : > { %v991_v31 = vpack.c.bf16 %v664_v21, %v663_v20  ;;  %v669_v33 = vadd.f32 %v948_v19, %v646_v29  ;;  %v996_v38 = vpack.c.bf16 %v666_v26, %v665_v25  ;;  %v672_v40 = vadd.f32 %v948_v19, %v649_v36  ;;  %v652_v43 = vld [vmem:[#allocation2 + $0x60] sm:$0xff]  ;;  %v653_v44 = vld [vmem:[#allocation2 + $0x70] sm:$0xff]  ;;  %v654_v49 = vld [vmem:[#allocation2 + $0x78] sm:$0xff] }
 0x1ac   : > { %v1001_v45 = vpack.c.bf16 %v668_v32, %v667_v28  ;;  %v674_v47 = vadd.f32 %v948_v19, %v651_v41  ;;  %v675_v48 = vadd.f32 %v948_v19, %v652_v43  ;;  %v676_v52 = vadd.f32 %v948_v19, %v653_v44 }
 0x1ad   : > { %v647_v30 = vld [vmem:[#allocation2 + $0x48] sm:$0xff]  ;;  %992 = vst [vmem:[%s1937_s2] sm:$0xff] %v991_v31   ;;  %1028 = vst [vmem:[%s1937_s2 + $0x8] sm:$0xff] %v996_v38   ;;  %v1011_v51 = vpack.c.bf16 %v672_v40, %v671_v39  ;;  %v677_v53 = vadd.f32 %v948_v19, %v654_v49 }
 0x1ae   : > { %v670_v34 = vadd.f32 %v948_v19, %v647_v30  ;;  %v655_v50 = vld [vmem:[#allocation2 + $0x28] sm:$0xff]  ;;  %1029 = vst [vmem:[%s1937_s2 + $0x10] sm:$0xff] %v1001_v45   ;;  %v1016_v55 = vpack.c.bf16 %v674_v47, %v673_v42  ;;  %v1021_v56 = vpack.c.bf16 %v676_v52, %v675_v48 }
 0x1af   : > { %v678_v54 = vadd.f32 %v948_v19, %v655_v50  ;;  %1031 = vst [vmem:[%s1937_s2 + $0x20] sm:$0xff] %v1011_v51  }
 0x1b0   : > { %v1006_v46 = vpack.c.bf16 %v670_v34, %v669_v33  ;;  %1032 = vst [vmem:[%s1937_s2 + $0x28] sm:$0xff] %v1016_v55   ;;  %1033 = vst [vmem:[%s1937_s2 + $0x30] sm:$0xff] %v1021_v56  }
 0x1b1   : > { %v1026_v57 = vpack.c.bf16 %v678_v54, %v677_v53 }
 0x1b2   : > { %1030 = vst [vmem:[%s1937_s2 + $0x18] sm:$0xff] %v1006_v46  }
 0x1b3   : > { %1034 = vst [vmem:[%s1937_s2 + $0x38] sm:$0xff] %v1026_v57  }
 0x1b4 PF: > { %s2171_s4 = sld [smem:[#allocation23_spill]]  ;;  %s775_s5 = sshll.u32 %s1937_s2, 4  ;;  %s2001_s5 = int_to_ptr.vmem [resolvable:$true] %s775_s5 }
 0x1b5   : > { %s2172_s13 = sld [smem:[#allocation22_spill]]  ;;  %s2010_s19 = scalar_lea.sflag [#allocation5], %s287_s24 }
 0x1b6   : > { %s2174_s3 = sld [smem:[#allocation33_spill]]  ;;  %s1403_s28 = scalar_lea.vmem %s2001_s5, 1024 }
 0x1b7   : > { %p1404_p10 = scmp.ne.s32.totalorder %s2001_s5, %s1403_s28  ;;  %p2175_p12 = scmp.ne.s32.totalorder %s2159_s10, 0 }
 0x1b8   : > { %s1607_s2 = smov [#allocation9]  }
 0x1b9   : > { %p1405_p9 = pnand %p1404_p10, %p2175_p12  ;;  %s1407_s11 = sshll.u32 %s1607_s2, 4  ;;  %s1408_s11 = int_to_ptr.vmem [resolvable:$false] %s1407_s11 }
 0x1ba   : > { %s1116_s26 = smul.u32 192, %s2171_s4  ;;  %s1409_s7 = scalar_lea.vmem %s1408_s11, 2048 }
 0x1bb   : > { %p1406_p3 = pneg %p1405_p9  ;;  %p1410_p1 = scmp.lt.s32.totalorder %s2001_s5, %s1408_s11 }
 0x1bc   : > { %s772_s0 = sadd.s32 %s2172_s13, %s1116_s26  ;;  %p1411_p2 = scmp.lt.s32.totalorder %s1409_s7, %s1403_s28 }
 0x1bd   : > { %s968_s25 = sshll.u32 %s772_s0, 6 }
 0x1be   : > { %s2006_s21 = scalar_lea.hbm %s2174_s3, %s968_s25  ;;  %p1412_p0 = por %p1411_p2, %p1410_p1 }
 0x1c0   : > { %p1413_p4 = pnand %p1412_p0, %p1406_p3 }
 0x1c2   : > { %1416 = shalt.err (!%p1413_p4)
}
 0x1c3   : > { %s1417_s24 = scalar_lea.hbm %s2006_s21, 1024  ;;  %s1421_s12 = scalar_lea.hbm %s2174_s3, 49152 }
 0x1c4   : > { %p1418_p13 = scmp.ne.s32.totalorder %s2006_s21, %s1417_s24  ;;  %p1422_p6 = scmp.lt.s32.totalorder %s2006_s21, %s2174_s3 }
 0x1c5   : > { %p1423_p11 = scmp.lt.s32.totalorder %s1421_s12, %s1417_s24 }
 0x1c6   : > { %p1419_p5 = pnand %p1418_p13, %p2175_p12 }
 0x1c7   : > { %p1424_p7 = por %p1423_p11, %p1422_p6 }
 0x1c8   : > { %p1420_p8 = pneg %p1419_p5 }
 0x1ca   : > { %p1425_p10 = pnand %p1424_p7, %p1420_p8 }
 0x1cc   : > { %1428 = shalt.err (!%p1425_p10)
}
 0x1cd   : > { %s1608_s25 = smov 64   ;;  %s1609_s18 = smov 768  }
 0x1ce   : > { %s1610_s1 = smov 4  }
 0x1cf   : > { %1123 = dma.vmem_to_hbm [thread:$0]  (%p2175_p12), %s2001_s5, 1024, %s2006_s21, %s2010_s19, %s1608_s25, %s1609_s18, %s1610_s1  }
 0x1d0 PF: > { %s2176_s28 = sld [smem:[#allocation14_spill]]  ;;  %p1140_p9 = scmp.ge.s32.totalorder %s1595_s30, 2 }
 0x1d1   : > { %p2177_p3 = scmp.ne.s32.totalorder %s2160_s8, 0 }
 0x1d3   : > { %p1136_p1 = pnand %p1140_p9, %p2177_p3 }
 0x1d5   : > { %p1137_p2 = pneg %p1136_p1 }
 0x1d6   : > { %s790_s2 = sand.u32 1, %s2176_s28  }
 0x1d7   : > { %s791_s11 = scalar_lea.sflag [#allocation5], %s790_s2 }
 0x1d8   : > { %1518 = dma.done.wait (%p1137_p2), %s791_s11, 1024  }
 0x1d9   : > { %1520 = vsyncadd (%p1137_p2), %s791_s11, 4294966272  ;;  %s22_s30 = sadd.s32 1, %s1595_s30   ;;  %s2179_s12 = sld [smem:[#allocation15_spill]] }
 0x1da   : > { %p2038_p0 = scmp.ge.s32.totalorder %s22_s30, 98   ;;  %s2180_s18 = sld [smem:[#allocation18_spill]] }
 0x1db   : > { %s2181_s19 = sld [smem:[#allocation19_spill]]  ;;  %s2183_s8 = smov %s1821_s15 }
 0x1dc   : > { %s2182_s10 = sld [smem:[#allocation27_spill]]  ;;  %s2187_s13 = smov %s1531_s14 }
 0x1dd   : > { %s2184_s25 = sld [smem:[#allocation24_spill]]  ;;  %s2188_s14 = smov %s1824_s6 }
 0x1de   : > { %s2185_s5 = sld [smem:[#allocation25_spill]]  ;;  %s2189_s15 = smov %s1539_s16 }
 0x1df   : > { %s2186_s28 = sld [smem:[#allocation26_spill]]  ;;  %s2190_s16 = smov %s1543_s17 }
 0x1e0   : > { %s2191_s17 = smov %s1865_s20  ;;  %s2193_s21 = smov %s1563_s22 }
 0x1e1   : > { %s2194_s22 = smov %s1567_s23  ;;  %s2195_s23 = smov %s2183_s8 }
 0x1e2   : > { %s2192_s20 = smov %s2182_s10  ;;  %s2196_s24 = smov %s1583_s27 }
 0x1e3   : > { %s2197_s26 = smov %s1591_s29  ;;  %s2199_s29 = smov %s2207_s9 }
 0x1e4   : > { %s2198_s27 = smov %s2185_s5  ;;  %21 = sbr.rel (!%p2038_p0) target bundleno = 20 (0x14), region = 109 }
 0x1e9   :  { %796 = vsyncpa [#allocation4], 1 }
 0x1ea   :  { %798 = vsyncpa [#allocation4 + $0x1], 1 }
 0x1eb   :  { %799 = vsyncpa [#allocation7], 1 }
 0x1ec   :  { %801 = vsyncpa [#allocation7 + $0x1], 1 }
 0x1ed   :  { %802 = vsyncpa [#allocation5], 1 }
 0x1ee   :  { %804 = vsyncpa [#allocation5 + $0x1], 1 }

</bundles_post_ra>
